<compile_context>
chip_gen: v7x
topology: tpu7x:2x2x1
jax: 0.10.0
libtpu: 0.0.40
codegen_flags: <defaults>
</compile_context>

<pallas_src>
import functools
import math

import jax
import jax.numpy as jnp
from jax import lax
from jax.experimental import pallas as pl
from jax.experimental.pallas import tpu as pltpu

BN_EPS = 1e-5
_GELU_C = math.sqrt(2.0 / math.pi)
_K_RESIDENT_MAX = 2048   # keep K resident per tile up to this many lanes
_TILE_M_MAX = 1024


def _round_up(n, m):
    return ((n + m - 1) // m) * m


def _cdiv(a, b):
    return (a + b - 1) // b


def _maybe_pad2(x, rows, cols):
    r, c = x.shape
    if r == rows and c == cols:
        return x
    return jnp.pad(x, ((0, rows - r), (0, cols - c)))


# ---------------------------------------------------------------------------
# Stage 1: per-channel BatchNorm scale/shift + bf16 copy of x.
# ---------------------------------------------------------------------------
def _bn_stats_kernel(x_ref, gamma_ref, beta_ref, a_ref, c_ref, xb_ref, *, inv_n):
    b = pl.program_id(0)

    @pl.when(b == 0)
    def _init():
        a_ref[...] = jnp.zeros_like(a_ref)   # accumulates sum(x)   per channel
        c_ref[...] = jnp.zeros_like(c_ref)   # accumulates sum(x^2) per channel

    x = x_ref[...]                                        # (1, T, D) f32
    xb_ref[...] = x.astype(jnp.bfloat16)                  # bf16 copy for the MXU stage
    a_ref[...] += jnp.sum(x, axis=(0, 2))[:, None]
    c_ref[...] += jnp.sum(x * x, axis=(0, 2))[:, None]

    @pl.when(b == pl.num_programs(0) - 1)
    def _finalize():
        mean = a_ref[...] * inv_n                         # (T, 1)
        # Single-pass variance can go slightly negative by cancellation: clamp.
        var = jnp.maximum(c_ref[...] * inv_n - mean * mean, 0.0)
        scale = gamma_ref[...] * lax.rsqrt(var + BN_EPS)
        a_ref[...] = scale
        c_ref[...] = beta_ref[...] - mean * scale


def _bn_scale_shift_and_cast(x, gamma, beta):
    B, T, D = x.shape
    kernel = functools.partial(_bn_stats_kernel, inv_n=1.0 / float(B * D))
    return pl.pallas_call(
        kernel,
        out_shape=(jax.ShapeDtypeStruct((T, 1), jnp.float32),
                   jax.ShapeDtypeStruct((T, 1), jnp.float32),
                   jax.ShapeDtypeStruct((B, T, D), jnp.bfloat16)),
        grid_spec=pltpu.PrefetchScalarGridSpec(
            num_scalar_prefetch=0,
            grid=(B,),
            in_specs=[
                pl.BlockSpec((1, T, D), lambda b: (b, 0, 0)),
                pl.BlockSpec((T, 1), lambda b: (0, 0)),
                pl.BlockSpec((T, 1), lambda b: (0, 0)),
            ],
            out_specs=[
                pl.BlockSpec((T, 1), lambda b: (0, 0)),
                pl.BlockSpec((T, 1), lambda b: (0, 0)),
                pl.BlockSpec((1, T, D), lambda b: (b, 0, 0)),
            ],
        ),
        compiler_params=pltpu.CompilerParams(
            dimension_semantics=("arbitrary",)),
    )(x, gamma.reshape(T, 1).astype(jnp.float32),
      beta.reshape(T, 1).astype(jnp.float32))


# ---------------------------------------------------------------------------
# Stage 2: tiled matmul with BN folded into the epilogue, GELU, residual.
# ---------------------------------------------------------------------------
def _dense_matmul_kernel(x_ref, a_ref, c_ref, w_ref, csum_ref, bias_ref, *rest,
                         is_residual, n_k):
    if is_residual:
        xres_ref = rest[0]
        rest = rest[1:]
    else:
        xres_ref = None
    if n_k > 1:
        o_ref, acc_ref = rest
    else:
        (o_ref,) = rest
        acc_ref = None

    # MXU: bf16 x (stored bf16 in HBM) x bf16 W with f32 accumulation.
    part = jnp.dot(x_ref[...], w_ref[...], preferred_element_type=jnp.float32)

    def _epilogue(dot_f32):
        a = a_ref[...]                                    # (TM, 1) f32
        c = c_ref[...]                                    # (TM, 1) f32
        # Folded BatchNorm:  y = a*(x @ W) + c*colsum(W) + bias
        y = a * dot_f32 + (c * csum_ref[...] + bias_ref[...])
        # tanh-approximate GELU (EUP slot instead of a long VALU erf polynomial).
        g = 0.5 * y * (1.0 + jnp.tanh(_GELU_C * (y + 0.044715 * (y * y * y))))
        if is_residual:
            # x_hat = a*x + c from an f32 (i, j)-blocked residual input.
            g = a * xres_ref[...] + c + g
        o_ref[...] = g.astype(o_ref.dtype)

    if n_k == 1:
        _epilogue(part)
    else:
        k = pl.program_id(2)

        @pl.when(k == 0)
        def _():
            acc_ref[...] = part

        @pl.when(k > 0)
        def _():
            acc_ref[...] += part

        @pl.when(k == n_k - 1)
        def _():
            _epilogue(acc_ref[...])


@functools.partial(jax.jit, static_argnames=("is_residual",))
def dense_layer_forward(x, gamma, beta, w, b, *, is_residual):
    """x: (B, T, D); gamma/beta: (T,); w: (D, O) (= torch weight.T); b: (O,)."""
    B, T, D = x.shape
    O = w.shape[1]
    is_residual = bool(is_residual and D == O)

    x = x.astype(jnp.float32)
    w = w.astype(jnp.float32)
    b = b.astype(jnp.float32)

    # ---- Stage 1: per-channel BN scale/shift + bf16 copy of x ----
    a_t, c_t, x_bf = _bn_scale_shift_and_cast(x, gamma, beta)   # (T,1),(T,1),(B,T,D)

    # ---- Stage 2 tiling ----
    M = B * T

    # Rows: 16-sublane aligned (bf16 packing), tiles <= 1024, minimal padding.
    m_aligned = _round_up(M, 16)
    n_m = _cdiv(m_aligned, _TILE_M_MAX)
    tile_m = _round_up(_cdiv(m_aligned, n_m), 16)
    m_pad = tile_m * n_m
    gm = n_m

    # Output columns: lane-dense tile that divides round_up(O,128) -> no N waste.
    o_aligned = _round_up(O, 128)
    tile_n = 128
    for cand in (512, 256):
        if o_aligned % cand == 0:
            tile_n = cand
            break
    o_pad = o_aligned
    gn = o_pad // tile_n

    # Reduction: resident up to _K_RESIDENT_MAX lanes, else K grid axis.
    k_aligned = _round_up(D, 128)
    n_k = _cdiv(k_aligned, _K_RESIDENT_MAX)
    tile_k = _round_up(_cdiv(k_aligned, n_k), 128)
    k_pad = tile_k * n_k

    # Expose >= 2 parallel tiles for multi-TensorCore chips when possible.
    if gm == 1 and gn == 1 and tile_n % 256 == 0:
        tile_n //= 2
        gn = 2

    # ---- operands (bf16 x / W for the MXU; f32 epilogue vectors) ----
    x2 = _maybe_pad2(x_bf.reshape(M, D), m_pad, k_pad)            # bf16
    w_p = _maybe_pad2(w.astype(jnp.bfloat16), k_pad, o_pad)       # bf16
    csum = _maybe_pad2(jnp.sum(w, axis=0).reshape(1, O), 1, o_pad)
    bias = _maybe_pad2(b.reshape(1, O), 1, o_pad)
    a_rows = _maybe_pad2(
        jnp.broadcast_to(a_t.reshape(1, T), (B, T)).reshape(M, 1), m_pad, 1)
    c_rows = _maybe_pad2(
        jnp.broadcast_to(c_t.reshape(1, T), (B, T)).reshape(M, 1), m_pad, 1)

    in_specs = [
        pl.BlockSpec((tile_m, tile_k), lambda i, j, k: (i, k)),   # x (bf16)
        pl.BlockSpec((tile_m, 1), lambda i, j, k: (i, 0)),        # a[row]
        pl.BlockSpec((tile_m, 1), lambda i, j, k: (i, 0)),        # c[row]
        pl.BlockSpec((tile_k, tile_n), lambda i, j, k: (k, j)),   # W (bf16)
        pl.BlockSpec((1, tile_n), lambda i, j, k: (0, j)),        # colsum(W)
        pl.BlockSpec((1, tile_n), lambda i, j, k: (0, j)),        # bias
    ]
    operands = [x2, a_rows, c_rows, w_p, csum, bias]
    if is_residual:
        # f32 residual source blocked (i, j): decouples k_pad from o_pad and
        # keeps the residual add in full precision.
        x_res = _maybe_pad2(x.reshape(M, D), m_pad, o_pad)
        in_specs.append(pl.BlockSpec((tile_m, tile_n), lambda i, j, k: (i, j)))
        operands.append(x_res)

    scratch_shapes = ()
    if n_k > 1:
        scratch_shapes = (pltpu.VMEM((tile_m, tile_n), jnp.float32),)

    # VMEM limit with headroom vs the physical capacity (64 MiB/TC on v7x,
    # 128 MiB on v5e/v6e); never request the whole thing.
    try:
        vmem_cap = int(pltpu.get_tpu_info().vmem_capacity_bytes)
    except Exception:
        vmem_cap = 64 * 1024 * 1024
    vmem_limit = min(96 * 1024 * 1024, (vmem_cap * 3) // 4)

    kernel = functools.partial(_dense_matmul_kernel,
                               is_residual=is_residual, n_k=n_k)
    out = pl.pallas_call(
        kernel,
        out_shape=jax.ShapeDtypeStruct((m_pad, o_pad), jnp.float32),
        grid_spec=pltpu.PrefetchScalarGridSpec(
            num_scalar_prefetch=0,
            grid=(gm, gn, n_k),
            in_specs=in_specs,
            out_specs=pl.BlockSpec((tile_m, tile_n), lambda i, j, k: (i, j)),
            scratch_shapes=scratch_shapes,
        ),
        compiler_params=pltpu.CompilerParams(
            dimension_semantics=("parallel", "parallel", "arbitrary"),
            vmem_limit_bytes=vmem_limit),
    )(*operands)

    return out[:M, :O].reshape(B, T, O)


# ---------------------------------------------------------------------------
# Pure-JAX reference matching PyTorch DenseLayer.forward (training-mode BN,
# exact-erf GELU).  Used for tolerance checks only.
# ---------------------------------------------------------------------------
def dense_layer_reference(x, gamma, beta, w, b, *, is_residual):
    mean = jnp.mean(x, axis=(0, 2), keepdims=True)
    var = jnp.mean((x - mean) ** 2, axis=(0, 2), keepdims=True)
    x_hat = (x - mean) / jnp.sqrt(var + BN_EPS)
    x_hat = x_hat * gamma[None, :, None] + beta[None, :, None]
    y = jnp.einsum("btd,do->bto", x_hat, w) + b[None, None, :]
    g = 0.5 * y * (1.0 + jax.scipy.special.erf(y / jnp.sqrt(2.0)))
    if is_residual and x.shape[-1] == w.shape[1]:
        return x_hat + g
    return g


def _run_case(key, B, T, D, O, is_residual, atol):
    kx, kg, kb, kw, kbias = jax.random.split(key, 5)
    x = jax.random.normal(kx, (B, T, D), dtype=jnp.float32)
    gamma = 1.0 + 0.1 * jax.random.normal(kg, (T,), dtype=jnp.float32)
    beta = 0.1 * jax.random.normal(kb, (T,), dtype=jnp.float32)
    bound = 1.0 / math.sqrt(D)
    w = jax.random.uniform(kw, (D, O), minval=-bound, maxval=bound,
                           dtype=jnp.float32)
    b = jax.random.uniform(kbias, (O,), minval=-bound, maxval=bound,
                           dtype=jnp.float32)

    out = jax.block_until_ready(
        dense_layer_forward(x, gamma, beta, w, b, is_residual=is_residual))
    ref = dense_layer_reference(x, gamma, beta, w, b, is_residual=is_residual)
    assert out.shape == (B, T, O), out.shape
    err = float(jnp.max(jnp.abs(out - ref)))
    # Tolerance loosened vs exact f32/erf reference: bf16 MXU operands + tanh-GELU.
    assert err < atol, (B, T, D, O, is_residual, err)


if __name__ == "__main__":
    key = jax.random.PRNGKey(0)
    k1, k2, k3, k4 = jax.random.split(key, 4)
    # Small shapes consistent with DenseLayer(bn_dim=T, input_dim=D, output_dim=O).
    _run_case(k1, B=2, T=8, D=32, O=32, is_residual=True, atol=2e-2)
    # Non-residual path (input_dim != output_dim).
    _run_case(k2, B=2, T=8, D=32, O=64, is_residual=False, atol=2e-2)
    # Multi-tile N grid, residual from a separate (i, j)-blocked f32 input.
    _run_case(k3, B=2, T=300, D=576, O=576, is_residual=True, atol=3e-2)
    # Large input_dim: exercises the K grid axis + f32 VMEM accumulator path.
    _run_case(k4, B=2, T=16, D=2304, O=128, is_residual=False, atol=3e-2)
    print("KERNEL_OK")
</pallas_src>

<mosaic_0001>
module attributes {stable_mosaic.version = 11 : i64} {
  func.func @_bn_stats_kernel(%arg0: i32, %arg1: memref<1x8x32xf32, #tpu.memory_space<vmem>>, %arg2: memref<8x1xf32, #tpu.memory_space<vmem>>, %arg3: memref<8x1xf32, #tpu.memory_space<vmem>>, %arg4: memref<8x1xf32, #tpu.memory_space<vmem>>, %arg5: memref<8x1xf32, #tpu.memory_space<vmem>>, %arg6: memref<1x8x32xbf16, #tpu.memory_space<vmem>>) attributes {dimension_semantics = [#tpu.dimension_semantics<arbitrary>], iteration_bounds = array<i64: 2>, scalar_prefetch = 0 : i64, scratch_operands = 0 : i64, tpu.core_type = #tpu.core_type<tc>, window_params = [{transform_indices = @transform_0, window_bounds = array<i64: 1, 8, 32>}, {pipeline_mode = #tpu.pipeline_mode<synchronous>, transform_indices = @transform_1, window_bounds = array<i64: 8, 1>}, {pipeline_mode = #tpu.pipeline_mode<synchronous>, transform_indices = @transform_2, window_bounds = array<i64: 8, 1>}, {pipeline_mode = #tpu.pipeline_mode<synchronous>, transform_indices = @transform_3, window_bounds = array<i64: 8, 1>}, {pipeline_mode = #tpu.pipeline_mode<synchronous>, transform_indices = @transform_4, window_bounds = array<i64: 8, 1>}, {transform_indices = @transform_5, window_bounds = array<i64: 1, 8, 32>}]} {
    %c0_i32 = arith.constant 0 : i32
    %0 = arith.cmpi eq, %arg0, %c0_i32 : i32
    %1 = arith.extui %0 : i1 to i32
    %c0_i32_0 = arith.constant 0 : i32
    %2 = arith.cmpi ne, %1, %c0_i32_0 : i32
    scf.if %2 {
      %cst_16 = arith.constant 0.000000e+00 : f32
      %20 = vector.broadcast %cst_16 : f32 to vector<8x1xf32>
      %c0_17 = arith.constant 0 : index
      %c0_18 = arith.constant 0 : index
      %21 = vector.load %arg4[%c0_17, %c0_18] : memref<8x1xf32, #tpu.memory_space<vmem>>, vector<8x1xf32>
      tpu.vector_store %arg4[%c0_17, %c0_18], %20 {strides = array<i32>} : memref<8x1xf32, #tpu.memory_space<vmem>>, vector<8x1xf32>,
      %cst_19 = arith.constant 0.000000e+00 : f32
      %22 = vector.broadcast %cst_19 : f32 to vector<8x1xf32>
      %c0_20 = arith.constant 0 : index
      %c0_21 = arith.constant 0 : index
      %23 = vector.load %arg5[%c0_20, %c0_21] : memref<8x1xf32, #tpu.memory_space<vmem>>, vector<8x1xf32>
      tpu.vector_store %arg5[%c0_20, %c0_21], %22 {strides = array<i32>} : memref<8x1xf32, #tpu.memory_space<vmem>>, vector<8x1xf32>,
    } else {
    }
    %c0 = arith.constant 0 : index
    %c0_1 = arith.constant 0 : index
    %c0_2 = arith.constant 0 : index
    %3 = vector.load %arg1[%c0, %c0_1, %c0_2] : memref<1x8x32xf32, #tpu.memory_space<vmem>>, vector<1x8x32xf32>
    %4 = arith.truncf %3 : vector<1x8x32xf32> to vector<1x8x32xbf16>
    %c0_3 = arith.constant 0 : index
    %c0_4 = arith.constant 0 : index
    %c0_5 = arith.constant 0 : index
    %5 = vector.load %arg6[%c0_3, %c0_4, %c0_5] : memref<1x8x32xbf16, #tpu.memory_space<vmem>>, vector<1x8x32xbf16>
    tpu.vector_store %arg6[%c0_3, %c0_4, %c0_5], %4 {strides = array<i32>} : memref<1x8x32xbf16, #tpu.memory_space<vmem>>, vector<1x8x32xbf16>,
    %c0_6 = arith.constant 0 : index
    %c0_7 = arith.constant 0 : index
    %6 = vector.load %arg4[%c0_6, %c0_7] : memref<8x1xf32, #tpu.memory_space<vmem>>, vector<8x1xf32>
    %cst = arith.constant dense<0.000000e+00> : vector<8xf32>
    %7 = vector.multi_reduction <add>, %3, %cst [0, 2] : vector<1x8x32xf32> to vector<8xf32>
    %8 = vector.shape_cast %7 : vector<8xf32> to vector<8x1xf32>
    %9 = arith.addf %6, %8 : vector<8x1xf32>
    %c0_8 = arith.constant 0 : index
    %c0_9 = arith.constant 0 : index
    %10 = vector.load %arg4[%c0_8, %c0_9] : memref<8x1xf32, #tpu.memory_space<vmem>>, vector<8x1xf32>
    tpu.vector_store %arg4[%c0_8, %c0_9], %9 {strides = array<i32>} : memref<8x1xf32, #tpu.memory_space<vmem>>, vector<8x1xf32>,
    %c0_10 = arith.constant 0 : index
    %c0_11 = arith.constant 0 : index
    %11 = vector.load %arg5[%c0_10, %c0_11] : memref<8x1xf32, #tpu.memory_space<vmem>>, vector<8x1xf32>
    %12 = arith.mulf %3, %3 : vector<1x8x32xf32>
    %cst_12 = arith.constant dense<0.000000e+00> : vector<8xf32>
    %13 = vector.multi_reduction <add>, %12, %cst_12 [0, 2] : vector<1x8x32xf32> to vector<8xf32>
    %14 = vector.shape_cast %13 : vector<8xf32> to vector<8x1xf32>
    %15 = arith.addf %11, %14 : vector<8x1xf32>
    %c0_13 = arith.constant 0 : index
    %c0_14 = arith.constant 0 : index
    %16 = vector.load %arg5[%c0_13, %c0_14] : memref<8x1xf32, #tpu.memory_space<vmem>>, vector<8x1xf32>
    tpu.vector_store %arg5[%c0_13, %c0_14], %15 {strides = array<i32>} : memref<8x1xf32, #tpu.memory_space<vmem>>, vector<8x1xf32>,
    %c1_i32 = arith.constant 1 : i32
    %17 = arith.cmpi eq, %arg0, %c1_i32 : i32
    %18 = arith.extui %17 : i1 to i32
    %c0_i32_15 = arith.constant 0 : i32
    %19 = arith.cmpi ne, %18, %c0_i32_15 : i32
    scf.if %19 {
      %c0_16 = arith.constant 0 : index
      %c0_17 = arith.constant 0 : index
      %20 = vector.load %arg4[%c0_16, %c0_17] : memref<8x1xf32, #tpu.memory_space<vmem>>, vector<8x1xf32>
      %cst_18 = arith.constant 1.562500e-02 : f32
      %21 = vector.broadcast %cst_18 : f32 to vector<8x1xf32>
      %22 = arith.mulf %20, %21 : vector<8x1xf32>
      %c0_19 = arith.constant 0 : index
      %c0_20 = arith.constant 0 : index
      %23 = vector.load %arg5[%c0_19, %c0_20] : memref<8x1xf32, #tpu.memory_space<vmem>>, vector<8x1xf32>
      %cst_21 = arith.constant 1.562500e-02 : f32
      %24 = vector.broadcast %cst_21 : f32 to vector<8x1xf32>
      %25 = arith.mulf %23, %24 : vector<8x1xf32>
      %26 = arith.mulf %22, %22 : vector<8x1xf32>
      %27 = arith.subf %25, %26 : vector<8x1xf32>
      %cst_22 = arith.constant 0.000000e+00 : f32
      %28 = vector.broadcast %cst_22 : f32 to vector<8x1xf32>
      %29 = arith.maximumf %27, %28 : vector<8x1xf32>
      %c0_23 = arith.constant 0 : index
      %c0_24 = arith.constant 0 : index
      %30 = vector.load %arg2[%c0_23, %c0_24] : memref<8x1xf32, #tpu.memory_space<vmem>>, vector<8x1xf32>
      %cst_25 = arith.constant 9.99999974E-6 : f32
      %31 = vector.broadcast %cst_25 : f32 to vector<8x1xf32>
      %32 = arith.addf %29, %31 : vector<8x1xf32>
      %33 = math.rsqrt %32 : vector<8x1xf32>
      %34 = arith.mulf %30, %33 : vector<8x1xf32>
      %c0_26 = arith.constant 0 : index
      %c0_27 = arith.constant 0 : index
      %35 = vector.load %arg4[%c0_26, %c0_27] : memref<8x1xf32, #tpu.memory_space<vmem>>, vector<8x1xf32>
      tpu.vector_store %arg4[%c0_26, %c0_27], %34 {strides = array<i32>} : memref<8x1xf32, #tpu.memory_space<vmem>>, vector<8x1xf32>,
      %c0_28 = arith.constant 0 : index
      %c0_29 = arith.constant 0 : index
      %36 = vector.load %arg3[%c0_28, %c0_29] : memref<8x1xf32, #tpu.memory_space<vmem>>, vector<8x1xf32>
      %37 = arith.mulf %22, %34 : vector<8x1xf32>
      %38 = arith.subf %36, %37 : vector<8x1xf32>
      %c0_30 = arith.constant 0 : index
      %c0_31 = arith.constant 0 : index
      %39 = vector.load %arg5[%c0_30, %c0_31] : memref<8x1xf32, #tpu.memory_space<vmem>>, vector<8x1xf32>
      tpu.vector_store %arg5[%c0_30, %c0_31], %38 {strides = array<i32>} : memref<8x1xf32, #tpu.memory_space<vmem>>, vector<8x1xf32>,
    } else {
    }
    return
  }
  func.func @transform_0(%arg0: i32) -> (i32, i32, i32) {
    %c0_i32 = arith.constant 0 : i32
    %c0_i32_0 = arith.constant 0 : i32
    %c0_i32_1 = arith.constant 0 : i32
    return %arg0, %c0_i32, %c0_i32_0 : i32, i32, i32
  }
  func.func @transform_1(%arg0: i32) -> (i32, i32) {
    %c0_i32 = arith.constant 0 : i32
    %c0_i32_0 = arith.constant 0 : i32
    %c0_i32_1 = arith.constant 0 : i32
    return %c0_i32, %c0_i32_0 : i32, i32
  }
  func.func @transform_2(%arg0: i32) -> (i32, i32) {
    %c0_i32 = arith.constant 0 : i32
    %c0_i32_0 = arith.constant 0 : i32
    %c0_i32_1 = arith.constant 0 : i32
    return %c0_i32, %c0_i32_0 : i32, i32
  }
  func.func @transform_3(%arg0: i32) -> (i32, i32) {
    %c0_i32 = arith.constant 0 : i32
    %c0_i32_0 = arith.constant 0 : i32
    %c0_i32_1 = arith.constant 0 : i32
    return %c0_i32, %c0_i32_0 : i32, i32
  }
  func.func @transform_4(%arg0: i32) -> (i32, i32) {
    %c0_i32 = arith.constant 0 : i32
    %c0_i32_0 = arith.constant 0 : i32
    %c0_i32_1 = arith.constant 0 : i32
    return %c0_i32, %c0_i32_0 : i32, i32
  }
  func.func @transform_5(%arg0: i32) -> (i32, i32, i32) {
    %c0_i32 = arith.constant 0 : i32
    %c0_i32_0 = arith.constant 0 : i32
    %c0_i32_1 = arith.constant 0 : i32
    return %arg0, %c0_i32, %c0_i32_0 : i32, i32, i32
  }
}

module attributes {stable_mosaic.version = 11 : i64} {
  func.func @_dense_matmul_kernel(%arg0: i32, %arg1: i32, %arg2: i32, %arg3: memref<16x128xbf16, #tpu.memory_space<vmem>>, %arg4: memref<16x1xf32, #tpu.memory_space<vmem>>, %arg5: memref<16x1xf32, #tpu.memory_space<vmem>>, %arg6: memref<128x128xbf16, #tpu.memory_space<vmem>>, %arg7: memref<1x128xf32, #tpu.memory_space<vmem>>, %arg8: memref<1x128xf32, #tpu.memory_space<vmem>>, %arg9: memref<16x128xf32, #tpu.memory_space<vmem>>, %arg10: memref<16x128xf32, #tpu.memory_space<vmem>>) attributes {dimension_semantics = [#tpu.dimension_semantics<parallel>, #tpu.dimension_semantics<parallel>, #tpu.dimension_semantics<arbitrary>], iteration_bounds = array<i64: 1, 1, 1>, scalar_prefetch = 0 : i64, scratch_operands = 0 : i64, tpu.core_type = #tpu.core_type<tc>, window_params = [{transform_indices = @transform_0, window_bounds = array<i64: 16, 128>}, {transform_indices = @transform_1, window_bounds = array<i64: 16, 1>}, {transform_indices = @transform_2, window_bounds = array<i64: 16, 1>}, {transform_indices = @transform_3, window_bounds = array<i64: 128, 128>}, {transform_indices = @transform_4, window_bounds = array<i64: 1, 128>}, {transform_indices = @transform_5, window_bounds = array<i64: 1, 128>}, {transform_indices = @transform_6, window_bounds = array<i64: 16, 128>}, {transform_indices = @transform_7, window_bounds = array<i64: 16, 128>}]} {
    %c0 = arith.constant 0 : index
    %c0_0 = arith.constant 0 : index
    %0 = vector.load %arg3[%c0, %c0_0] : memref<16x128xbf16, #tpu.memory_space<vmem>>, vector<16x128xbf16>
    %c0_1 = arith.constant 0 : index
    %c0_2 = arith.constant 0 : index
    %1 = vector.load %arg6[%c0_1, %c0_2] : memref<128x128xbf16, #tpu.memory_space<vmem>>, vector<128x128xbf16>
    %cst = arith.constant dense<0.000000e+00> : vector<16x128xf32>
    %2 = tpu.matmul %0, %1, %cst {dimension_numbers = #tpu.dot_dimension_numbers<[1], [0], [0], [1], [0, 0, 1, 1], [], []>} : vector<16x128xbf16>, vector<128x128xbf16>, vector<16x128xf32> -> vector<16x128xf32>
    %c0_3 = arith.constant 0 : index
    %c0_4 = arith.constant 0 : index
    %3 = vector.load %arg4[%c0_3, %c0_4] : memref<16x1xf32, #tpu.memory_space<vmem>>, vector<16x1xf32>
    %c0_5 = arith.constant 0 : index
    %c0_6 = arith.constant 0 : index
    %4 = vector.load %arg5[%c0_5, %c0_6] : memref<16x1xf32, #tpu.memory_space<vmem>>, vector<16x1xf32>
    %5 = vector.broadcast %3 : vector<16x1xf32> to vector<16x128xf32>
    %6 = arith.mulf %5, %2 : vector<16x128xf32>
    %c0_7 = arith.constant 0 : index
    %c0_8 = arith.constant 0 : index
    %7 = vector.load %arg7[%c0_7, %c0_8] : memref<1x128xf32, #tpu.memory_space<vmem>>, vector<1x128xf32>
    %8 = vector.broadcast %4 : vector<16x1xf32> to vector<16x128xf32>
    %9 = vector.broadcast %7 : vector<1x128xf32> to vector<16x128xf32>
    %10 = arith.mulf %8, %9 : vector<16x128xf32>
    %c0_9 = arith.constant 0 : index
    %c0_10 = arith.constant 0 : index
    %11 = vector.load %arg8[%c0_9, %c0_10] : memref<1x128xf32, #tpu.memory_space<vmem>>, vector<1x128xf32>
    %12 = vector.broadcast %11 : vector<1x128xf32> to vector<16x128xf32>
    %13 = arith.addf %10, %12 : vector<16x128xf32>
    %14 = arith.addf %6, %13 : vector<16x128xf32>
    %cst_11 = arith.constant 5.000000e-01 : f32
    %15 = vector.broadcast %cst_11 : f32 to vector<16x128xf32>
    %16 = arith.mulf %15, %14 : vector<16x128xf32>
    %17 = arith.mulf %14, %14 : vector<16x128xf32>
    %18 = arith.mulf %17, %14 : vector<16x128xf32>
    %cst_12 = arith.constant 4.471500e-02 : f32
    %19 = vector.broadcast %cst_12 : f32 to vector<16x128xf32>
    %20 = arith.mulf %19, %18 : vector<16x128xf32>
    %21 = arith.addf %14, %20 : vector<16x128xf32>
    %cst_13 = arith.constant 0.797884583 : f32
    %22 = vector.broadcast %cst_13 : f32 to vector<16x128xf32>
    %23 = arith.mulf %22, %21 : vector<16x128xf32>
    %24 = math.tanh %23 : vector<16x128xf32>
    %cst_14 = arith.constant 1.000000e+00 : f32
    %25 = vector.broadcast %cst_14 : f32 to vector<16x128xf32>
    %26 = arith.addf %25, %24 : vector<16x128xf32>
    %27 = arith.mulf %16, %26 : vector<16x128xf32>
    %c0_15 = arith.constant 0 : index
    %c0_16 = arith.constant 0 : index
    %28 = vector.load %arg9[%c0_15, %c0_16] : memref<16x128xf32, #tpu.memory_space<vmem>>, vector<16x128xf32>
    %29 = vector.broadcast %3 : vector<16x1xf32> to vector<16x128xf32>
    %30 = arith.mulf %29, %28 : vector<16x128xf32>
    %31 = vector.broadcast %4 : vector<16x1xf32> to vector<16x128xf32>
    %32 = arith.addf %30, %31 : vector<16x128xf32>
    %33 = arith.addf %32, %27 : vector<16x128xf32>
    %c0_17 = arith.constant 0 : index
    %c0_18 = arith.constant 0 : index
    %34 = vector.load %arg10[%c0_17, %c0_18] : memref<16x128xf32, #tpu.memory_space<vmem>>, vector<16x128xf32>
    tpu.vector_store %arg10[%c0_17, %c0_18], %33 {strides = array<i32>} : memref<16x128xf32, #tpu.memory_space<vmem>>, vector<16x128xf32>,
    return
  }
  func.func @transform_0(%arg0: i32, %arg1: i32, %arg2: i32) -> (i32, i32) {
    %c0_i32 = arith.constant 0 : i32
    return %arg0, %arg2 : i32, i32
  }
  func.func @transform_1(%arg0: i32, %arg1: i32, %arg2: i32) -> (i32, i32) {
    %c0_i32 = arith.constant 0 : i32
    %c0_i32_0 = arith.constant 0 : i32
    return %arg0, %c0_i32 : i32, i32
  }
  func.func @transform_2(%arg0: i32, %arg1: i32, %arg2: i32) -> (i32, i32) {
    %c0_i32 = arith.constant 0 : i32
    %c0_i32_0 = arith.constant 0 : i32
    return %arg0, %c0_i32 : i32, i32
  }
  func.func @transform_3(%arg0: i32, %arg1: i32, %arg2: i32) -> (i32, i32) {
    %c0_i32 = arith.constant 0 : i32
    return %arg2, %arg1 : i32, i32
  }
  func.func @transform_4(%arg0: i32, %arg1: i32, %arg2: i32) -> (i32, i32) {
    %c0_i32 = arith.constant 0 : i32
    %c0_i32_0 = arith.constant 0 : i32
    return %c0_i32, %arg1 : i32, i32
  }
  func.func @transform_5(%arg0: i32, %arg1: i32, %arg2: i32) -> (i32, i32) {
    %c0_i32 = arith.constant 0 : i32
    %c0_i32_0 = arith.constant 0 : i32
    return %c0_i32, %arg1 : i32, i32
  }
  func.func @transform_6(%arg0: i32, %arg1: i32, %arg2: i32) -> (i32, i32) {
    %c0_i32 = arith.constant 0 : i32
    return %arg0, %arg1 : i32, i32
  }
  func.func @transform_7(%arg0: i32, %arg1: i32, %arg2: i32) -> (i32, i32) {
    %c0_i32 = arith.constant 0 : i32
    return %arg0, %arg1 : i32, i32
  }
}

</mosaic_0001>

<bundles_post_ra>
// kernel: dense_layer_forward.2
= control target key start
LH: loop header
LB: loop body
LE: loop exit
PB: predicated region body
PF: predicated region fallthrough
CT: control target
= control target key end

     0   :  { %s387_s18 = smov 0   ;;  %s450_s0 = inlined_call_operand.vmem [shape: f32[2,8,32], index: 0, kind: input, shape index: {}]   ;;  %s451_s1 = inlined_call_operand.vmem [shape: f32[8,1], index: 1, kind: input, shape index: {}]   ;;  %s452_s2 = inlined_call_operand.vmem [shape: f32[8,1], index: 2, kind: input, shape index: {}]   ;;  %s453_s3 = inlined_call_operand.vmem [shape: f32[8,1], index: 3, kind: output, shape index: {0}]   ;;  %s454_s4 = inlined_call_operand.vmem [shape: f32[8,1], index: 4, kind: output, shape index: {1}]   ;;  %s455_s5 = inlined_call_operand.vmem [shape: bf16[2,8,32], index: 5, kind: output, shape index: {2}]  }
   0x1 LB: > { %s393_s19 = sadd.s32 4294967295, %s354_s18   ;;  %p330_p0 = scmp.ge.s32.totalorder %s354_s18, 1  ;;  %s354_s18 = sphi %s387_s18, %s16_s18  }
   0x2   : > { %p181_p1 = scmp.lt.s32.totalorder %s354_s18, 3 }
   0x4   : > { %p182_p2 = pnand %p330_p0, %p181_p1 }
   0x5   : > { %p207_p3 = scmp.lt.s32.totalorder (!%p182_p2), %s393_s19, 1  ;;  %p333_p4 = scmp.ne.s32.totalorder (!%p182_p2), %s393_s19, 0 }
   0x6   : > { %185 = sbr.rel (%p182_p2) target bundleno = 205 (0xcd), region = 32 }
   0xd   : > { %s208_s20 = scalar_select %p207_p3, %s393_s19, 1 }
   0xe   : > { %218 = sbr.rel (%p333_p4) target bundleno = 21 (0x15), region = 36  ;;  %vm219_vm0 = vcmask (!%p333_p4), 7168   ;;  %v356_v0 = vmov (!%p333_p4), 0.0  }
   0xf   : > { %s331_s21 = sshll.u32 %s208_s20, 3  ;;  %s332_s22 = sshll.u32 %s208_s20, 2  ;;  %220 = vst.msk [vmem:[%s453_s3] sm:$0xff] (!%p333_p4), %vm219_vm0, %v356_v0  ;;  %221 = vst.msk [vmem:[%s454_s4] sm:$0xff] (!%p333_p4), %vm219_vm0, %v356_v0 }
  0x10   : > { %s210_s25 = scalar_lea.vmem %s450_s0, %s331_s21  ;;  %s214_s28 = scalar_lea.vmem %s455_s5, %s332_s22 }
  0x15 PF: > { %v222_v1 = vld [vmem:[%s210_s25] sm:$0xff]  ;;  %vm224_vm1 = vcmask 257024   ;;  %vm227_vm2 = vcmask 261120   ;;  %vm232_vm3 = vcmask 7168   ;;  %p334_p5 = scmp.ne.s32.totalorder %s393_s19, 1 }
  0x16   : > { %v228_v2 = vsel %vm227_vm2, %v222_v1, 0.0  ;;  %v223_v3 = vpack.c.bf16 %v222_v1, %v222_v1  ;;  %v235_v4 = vmul.f32 %v222_v1, %v222_v1  ;;  %v226_v6 = vld [vmem:[%s453_s3] sm:$0xff] }
  0x17   : > { %229 = vadd.xlane.f32.xlu0 %v228_v2  ;;  %v234_v9 = vld [vmem:[%s454_s4] sm:$0xff] }
  0x18   : > { %225 = vst.msk [vmem:[%s214_s28] sm:$0xf] %vm224_vm1, %v223_v3  ;;  %v236_v5 = vsel %vm227_vm2, %v235_v4, 0.0  ;;  %v252_v20 = vld [vmem:[%s451_s1] sm:$0xff] (!%p334_p5) }
  0x19   : > { %v257_v23 = vld [vmem:[%s452_s2] sm:$0xff] (!%p334_p5) }
  0x1b   : > { %237 = vadd.xlane.f32.xlu0 %v236_v5 }
  0xa4   : > { %v230_v7 = vpop.xlane.xlu0 %229 }
  0xa5   : > { %v231_v8 = vadd.f32 %v230_v7, %v226_v6  ;;  %244 = sbr.rel (%p334_p5) target bundleno = 205 (0xcd), region = 40 }
  0xa7   : > { %233 = vst.msk [vmem:[%s453_s3] sm:$0xff] %vm232_vm3, %v231_v8 }
  0xa8   : > { %v238_v10 = vpop.xlane.xlu0 %237 }
  0xa9   : > { %v239_v11 = vadd.f32 %v238_v10, %v234_v9 }
  0xab   : > { %240 = vst.msk [vmem:[%s454_s4] sm:$0xff] %vm232_vm3, %v239_v11 }
  0xae   : > { %v245_v12 = vld [vmem:[%s453_s3] sm:$0xff] }
  0xaf   : > { %v246_v14 = vmul.f32 0.015625, %v245_v12 }
  0xb1   : > { %v249_v16 = vmul.f32 %v246_v14, %v246_v14 }
  0xb2   : > { %v247_v13 = vld [vmem:[%s454_s4] sm:$0xff] }
  0xb3   : > { %v248_v15 = vmul.f32 0.015625, %v247_v13 }
  0xb5   : > { %v250_v17 = vsub.f32 %v248_v15, %v249_v16 }
  0xb7   : > { %v251_v18 = vmax.f32 %v250_v17, 0.0 }
  0xb9   : > { %v253_v19 = vadd.f32 1e-05, %v251_v18 }
  0xbb   : > { %346 = vrsqrt.f32 %v253_v19 }
  0xc5   : > { %v347_v21 = vpop.eup %346 }
  0xc6   : > { %v255_v22 = vmul.f32 %v347_v21, %v252_v20 }
  0xc8   : > { %256 = vst.msk [vmem:[%s453_s3] sm:$0xff] %vm232_vm3, %v255_v22  ;;  %v258_v24 = vmul.f32 %v255_v22, %v246_v14 }
  0xca   : > { %v259_v25 = vsub.f32 %v257_v23, %v258_v24 }
  0xcc   : > { %260 = vst.msk [vmem:[%s454_s4] sm:$0xff] %vm232_vm3, %v259_v25 }
  0xcd PF: > { %s16_s18 = sadd.s32 1, %s354_s18  }
  0xce   : > { %p13_p6 = scmp.ge.s32.totalorder %s16_s18, 4  }
  0xd0   :  { %15 = sbr.rel (!%p13_p6) target bundleno = 1 (0x1), region = 86 }

// kernel: dense_layer_forward.3
= control target key start
LH: loop header
LB: loop body
LE: loop exit
PB: predicated region body
PF: predicated region fallthrough
CT: control target
= control target key end

     0   :  { %v276_v0 = vmov 0.0   ;;  %vm277_vm0 = vmmov 0   ;;  %v278_v2 = vmov 0   ;;  %s376_s3 = inlined_call_operand.vmem [shape: bf16[128,128], index: 3, kind: input, shape index: {}]   ;;  %s377_s1 = inlined_call_operand.vmem [shape: f32[16,1], index: 1, kind: input, shape index: {}]   ;;  %s378_s2 = inlined_call_operand.vmem [shape: f32[16,1], index: 2, kind: input, shape index: {}]   ;;  %s379_s0 = inlined_call_operand.vmem [shape: bf16[16,128], index: 0, kind: input, shape index: {}]   ;;  %s380_s4 = inlined_call_operand.vmem [shape: f32[1,128], index: 4, kind: input, shape index: {}]   ;;  %s381_s5 = inlined_call_operand.vmem [shape: f32[1,128], index: 5, kind: input, shape index: {}]   ;;  %s382_s6 = inlined_call_operand.vmem [shape: f32[16,128], index: 6, kind: input, shape index: {}]   ;;  %s383_s7 = inlined_call_operand.vmem [shape: f32[16,128], index: 7, kind: output, shape index: {}]  }
   0x1   :  { %238 = vmatprep.subr.bf16.mxu0 %v276_v0  ;;  %v263_v1 = vld [vmem:[%s376_s3] sm:$0xff]   ;;  %254 = vmatprep.mubr.msk.bf16.mxu0 %vm277_vm0, %v276_v0  ;;  %v264_v3 = vld [vmem:[%s376_s3 + $0x8] sm:$0xff]   ;;  %v265_v4 = vld [vmem:[%s376_s3 + $0x10] sm:$0xff]  }
   0x2   :  { %262 = vset.pattern.permute.xlu1 %v278_v2  ;;  %261 = vset.pattern.permute.xlu0 %v278_v2  ;;  %v140_v5 = vld [vmem:[%s377_s1] sm:$0xff]  ;;  %v266_v7 = vld [vmem:[%s376_s3 + $0x18] sm:$0xff]   ;;  %v141_v8 = vld [vmem:[%s377_s1 + $0x8] sm:$0xff] }
   0x3   :  { %239 = vmatpush3.bf16.msra.mxu0 %v263_v1  ;;  %v142_v6 = vld [vmem:[%s378_s2] sm:$0xff]  ;;  %146 = vperm.xlu1 %262, %v140_v5   ;;  %v143_v9 = vld [vmem:[%s378_s2 + $0x8] sm:$0xff]  ;;  %v269_v12 = vld [vmem:[%s376_s3 + $0x30] sm:$0xff]  }
   0x4   :  { %240 = vmatprep.subr.bf16.mxu0 %v276_v0  ;;  %159 = vperm.xlu0 %261, %v142_v6   ;;  %v267_v10 = vld [vmem:[%s376_s3 + $0x20] sm:$0xff]   ;;  %v268_v11 = vld [vmem:[%s376_s3 + $0x28] sm:$0xff]   ;;  %v270_v13 = vld [vmem:[%s376_s3 + $0x38] sm:$0xff]  }
   0x5   :  { %v271_v14 = vld [vmem:[%s379_s0] sm:$0xff]   ;;  %v205_v44 = vld [vmem:[%s382_s6 + $0x8] sm:$0xff] }
   0x6   :  { %v227_v16 = vld [vmem:[%s380_s4] ss:$0 sm:$0xff] }
   0x7   :  { %241 = vmatpush3.bf16.msra.mxu0 %v264_v3  ;;  %151 = vperm.xlu1 %262, %v141_v8   ;;  %v228_v20 = vld [vmem:[%s381_s5] ss:$0 sm:$0xff] }
   0x8   :  { %242 = vmatprep.subr.bf16.mxu0 %v276_v0  ;;  %164 = vperm.xlu0 %261, %v143_v9   ;;  %v204_v43 = vld [vmem:[%s382_s6] sm:$0xff] }
   0xb   :  { %243 = vmatpush3.bf16.msra.mxu0 %v265_v4 }
   0xc   :  { %244 = vmatprep.subr.bf16.mxu0 %v276_v0 }
   0xf   :  { %245 = vmatpush3.bf16.msra.mxu0 %v266_v7 }
  0x10   :  { %246 = vmatprep.subr.bf16.mxu0 %v276_v0 }
  0x13   :  { %247 = vmatpush3.bf16.msra.mxu0 %v267_v10 }
  0x14   :  { %248 = vmatprep.subr.bf16.mxu0 %v276_v0 }
  0x17   :  { %249 = vmatpush3.bf16.msra.mxu0 %v268_v11 }
  0x18   :  { %250 = vmatprep.subr.bf16.mxu0 %v276_v0 }
  0x1b   :  { %251 = vmatpush3.bf16.msra.mxu0 %v269_v12 }
  0x1c   :  { %252 = vmatprep.subr.bf16.mxu0 %v276_v0 }
  0x1f   :  { %253 = vmatpush3.bf16.msra.mxu0 %v270_v13 }
  0x22   :  { %255 = vmatmul.mubr.bf16.vlgmr.msra.gmra.mrb[0].mxu0 %v271_v14 }
  0x82   :  { %v147_v17 = vpop.permute.xlu1 %146 }
  0x83   :  { %v160_v15 = vpop.permute.xlu0 %159  ;;  %v206_v45 = vmul.f32 %v204_v43, %v147_v17 }
  0x84   :  { %v173_v19 = vmul.f32 %v227_v16, %v160_v15 }
  0x85   :  { %v208_v51 = vadd.f32 %v206_v45, %v160_v15 }
  0x86   :  { %v182_v24 = vadd.f32 %v228_v20, %v173_v19  ;;  %v152_v26 = vpop.permute.xlu1 %151 }
  0x87   :  { %v165_v18 = vpop.permute.xlu0 %164  ;;  %v207_v47 = vmul.f32 %v205_v44, %v152_v26 }
  0x88   :  { %v174_v21 = vmul.f32 %v227_v16, %v165_v18 }
  0x89   :  { %v209_v55 = vadd.f32 %v207_v47, %v165_v18 }
  0x8a   :  { %v183_v28 = vadd.f32 %v228_v20, %v174_v21 }
  0xf5   :  { %v133_v22 = vpop.f32.mrb[0].mxu0 }
  0xf6   :  { %v154_v23 = vmul.f32 %v147_v17, %v133_v22  ;;  %v256_v25 = vpop.f32.mrb[1].mxu0 }
  0xf7   :  { %v136_v27 = vpop.f32.mrb[2].mxu0 }
  0xf8   :  { %v184_v29 = vadd.f32 %v182_v24, %v154_v23  ;;  %v155_v30 = vmul.f32 %v152_v26, %v136_v27  ;;  %v257_v31 = vpop.f32.mrb[3].mxu0 }
  0xfa   :  { %v188_v32 = vmul.f32 %v184_v29, %v184_v29  ;;  %v185_v33 = vadd.f32 %v183_v28, %v155_v30  ;;  %v186_v48 = vmul.f32 0.5, %v184_v29 }
  0xfc   :  { %v190_v34 = vmul.f32 %v188_v32, %v184_v29  ;;  %v189_v35 = vmul.f32 %v185_v33, %v185_v33  ;;  %v187_v53 = vmul.f32 0.5, %v185_v33 }
  0xfe   :  { %v192_v36 = vmul.f32 0.044715, %v190_v34  ;;  %v191_v37 = vmul.f32 %v189_v35, %v185_v33 }
 0x100   :  { %v194_v38 = vadd.f32 %v192_v36, %v184_v29  ;;  %v193_v39 = vmul.f32 0.044715, %v191_v37 }
 0x102   :  { %v196_v40 = vmul.f32 0.7978846, %v194_v38  ;;  %v195_v41 = vadd.f32 %v193_v39, %v185_v33 }
 0x104   :  { %272 = vtanh.f32 %v196_v40  ;;  %v197_v42 = vmul.f32 0.7978846, %v195_v41 }
 0x106   :  { %274 = vtanh.f32 %v197_v42 }
 0x10e   :  { %v273_v46 = vpop.eup %272 }
 0x10f   :  { %v200_v49 = vadd.f32 1.0, %v273_v46 }
 0x110   :  { %v275_v50 = vpop.eup %274 }
 0x111   :  { %v202_v52 = vmul.f32 %v200_v49, %v186_v48  ;;  %v201_v54 = vadd.f32 1.0, %v275_v50 }
 0x113   :  { %v210_v56 = vadd.f32 %v208_v51, %v202_v52  ;;  %v203_v57 = vmul.f32 %v201_v54, %v187_v53 }
 0x115   :  { %212 = vst [vmem:[%s383_s7] sm:$0xff] %v210_v56  ;;  %v211_v58 = vadd.f32 %v209_v55, %v203_v57 }
 0x117   :  { %213 = vst [vmem:[%s383_s7 + $0x8] sm:$0xff] %v211_v58 }

</bundles_post_ra>
